<compile_context>
chip_gen: v5e
topology: v5e:2x2
jax: 0.10.0
libtpu: 0.0.40
codegen_flags: <defaults>
</compile_context>

<pallas_src>
import math

import numpy as np
import jax
import jax.numpy as jnp
from jax.experimental import pallas as pl
from jax.experimental.pallas import tpu as pltpu


def _block_perm_indices(nh_d: int, hs_d: int) -> np.ndarray:
    """Permutation within one 'a' block of size Cs = nh_d*hs_d*hs_d.

    out[..., j] = in[..., perm[j]] reproduces the (b, c, d) -> (c, b, d)
    reorder of the PyTorch view/permute/reshape (the outer 'a' index never
    moves, so the full C permutation is block-diagonal with nh_d identical
    blocks).
    """
    cs = nh_d * hs_d * hs_d
    perm = np.arange(cs, dtype=np.int64).reshape(nh_d, hs_d, hs_d)
    perm = perm.transpose(1, 0, 2).reshape(cs)
    return perm


def _perm_matrix(perm: np.ndarray) -> np.ndarray:
    """P such that (x @ P)[:, j] == x[:, perm[j]] (exact 0/1 matrix)."""
    cs = perm.shape[0]
    p = np.zeros((cs, cs), dtype=np.float32)
    p[perm, np.arange(cs)] = 1.0
    return p


def _reshape_attn_kernel(x_ref, p_ref, o_ref):
    # x_ref: (block_rows, Cs) tile; p_ref: (Cs, Cs) 0/1 permutation matrix.
    # Exact for float dtypes: each output element is one x value * 1.0,
    # accumulated in f32 and cast back.
    o_ref[...] = jnp.dot(
        x_ref[...], p_ref[...], preferred_element_type=jnp.float32
    ).astype(o_ref.dtype)


def _choose_block_rows(rows: int, cs: int, itemsize: int,
                       vmem_budget: int = 24 * 1024 * 1024,
                       max_block_rows: int = 1024) -> int:
    """Largest row tile whose working set fits the VMEM budget.

    Working set: 2x double-buffered input tile + 2x double-buffered output
    tile + 2x (Cs, Cs) P.
    """
    p_bytes = 2 * cs * cs * itemsize
    avail = max(vmem_budget - p_bytes, 2 * 1024 * 1024)
    br = avail // (4 * cs * itemsize)
    br = int(max(min(br, max_block_rows, rows), 1))
    # Prefer multiples of 256 (v6e/v7x MXU), then 128 (v5e MXU), then 8
    # (sublane granularity).
    for mult in (256, 128, 8):
        if br >= mult:
            return (br // mult) * mult
    return br


def reshape_attention(x: jax.Array, n_head: int, block_rows: int | None = None) -> jax.Array:
    B, T, C = x.shape
    if not jnp.issubdtype(x.dtype, jnp.floating):
        raise ValueError(
            f"MXU permutation-matrix path requires a float dtype, got {x.dtype}"
        )
    if C % n_head != 0:
        raise ValueError(f"C={C} must be divisible by n_head={n_head}")
    head_size = C // n_head
    nh_d = int(round(math.sqrt(n_head)))
    hs_d = int(round(math.sqrt(head_size)))
    if nh_d * nh_d != n_head:
        raise ValueError(f"n_head={n_head} must be a perfect square")
    if hs_d * hs_d != head_size:
        raise ValueError(f"head_size={head_size} must be a perfect square")

    cs = C // nh_d  # block-diagonal block width
    perm = _block_perm_indices(nh_d, hs_d)
    # 0/1 entries are exact in bf16/f32; match x.dtype for a fast MXU path.
    P = jnp.asarray(_perm_matrix(perm), dtype=x.dtype)

    rows = B * T * nh_d
    x2 = x.reshape(rows, cs)  # contiguous reshape: free

    if block_rows is None:
        block_rows = _choose_block_rows(rows, cs, x.dtype.itemsize)

    grid = (pl.cdiv(rows, block_rows),)

    out2 = pl.pallas_call(
        _reshape_attn_kernel,
        out_shape=jax.ShapeDtypeStruct((rows, cs), x.dtype),
        grid_spec=pltpu.PrefetchScalarGridSpec(
            num_scalar_prefetch=0,
            grid=grid,
            in_specs=[
                pl.BlockSpec((block_rows, cs), lambda i: (i, 0)),
                pl.BlockSpec((cs, cs), lambda i: (0, 0)),  # constant: tiny P
            ],
            out_specs=pl.BlockSpec((block_rows, cs), lambda i: (i, 0)),
        ),
        compiler_params=pltpu.CompilerParams(
            dimension_semantics=("parallel",),
            vmem_limit_bytes=32 * 1024 * 1024,
        ),
    )(x2, P)

    return out2.reshape(B, T, C)


def _reference(x: jax.Array, n_head: int) -> jax.Array:
    # Pure-JAX mirror of the PyTorch forward for verification.
    B, T, C = x.shape
    head_size = C // n_head
    nh_d = int(round(math.sqrt(n_head)))
    hs_d = int(round(math.sqrt(head_size)))
    y = x.reshape(B, T, nh_d, nh_d, hs_d, hs_d)
    y = jnp.transpose(y, (0, 1, 2, 4, 3, 5))
    return y.reshape(B, T, C)


if __name__ == "__main__":
    key = jax.random.PRNGKey(0)
    k1, k2 = jax.random.split(key)

    # Case 1: f32, n_head=4 (nh_d=2), head_size=16 (hs_d=4), C=64.
    B, T, C, n_head = 2, 8, 64, 4
    x1 = jax.random.normal(k1, (B, T, C), dtype=jnp.float32)
    out1 = jax.block_until_ready(reshape_attention(x1, n_head))
    ref1 = _reference(x1, n_head)
    if not np.array_equal(np.asarray(out1), np.asarray(ref1)):
        raise AssertionError("case 1: Pallas output does not match reference")

    # Case 2: bf16, ragged row count -> pl.cdiv grid with a partial last block.
    # n_head=16 (nh_d=4), head_size=16 (hs_d=4), C=256, rows = 2*17*4 = 136.
    B, T, C, n_head = 2, 17, 256, 16
    x2 = jax.random.normal(k2, (B, T, C), dtype=jnp.bfloat16)
    out2 = jax.block_until_ready(reshape_attention(x2, n_head, block_rows=64))
    ref2 = _reference(x2, n_head)
    if not np.array_equal(
        np.asarray(out2.astype(jnp.float32)), np.asarray(ref2.astype(jnp.float32))
    ):
        raise AssertionError("case 2: Pallas output does not match reference")

    print("KERNEL_OK")
</pallas_src>

<mosaic_0001>
module attributes {stable_mosaic.version = 11 : i64} {
  func.func @_reshape_attn_kernel(%arg0: i32, %arg1: memref<32x32xf32, #tpu.memory_space<vmem>>, %arg2: memref<32x32xf32, #tpu.memory_space<vmem>>, %arg3: memref<32x32xf32, #tpu.memory_space<vmem>>) attributes {dimension_semantics = [#tpu.dimension_semantics<parallel>], iteration_bounds = array<i64: 1>, scalar_prefetch = 0 : i64, scratch_operands = 0 : i64, tpu.core_type = #tpu.core_type<tc>, window_params = [{transform_indices = @transform_0, window_bounds = array<i64: 32, 32>}, {pipeline_mode = #tpu.pipeline_mode<synchronous>, transform_indices = @transform_1, window_bounds = array<i64: 32, 32>}, {transform_indices = @transform_2, window_bounds = array<i64: 32, 32>}]} {
    %c0 = arith.constant 0 : index
    %c0_0 = arith.constant 0 : index
    %0 = vector.load %arg1[%c0, %c0_0] : memref<32x32xf32, #tpu.memory_space<vmem>>, vector<32x32xf32>
    %c0_1 = arith.constant 0 : index
    %c0_2 = arith.constant 0 : index
    %1 = vector.load %arg2[%c0_1, %c0_2] : memref<32x32xf32, #tpu.memory_space<vmem>>, vector<32x32xf32>
    %cst = arith.constant dense<0.000000e+00> : vector<32x32xf32>
    %2 = tpu.matmul %0, %1, %cst {dimension_numbers = #tpu.dot_dimension_numbers<[1], [0], [0], [1], [0, 0, 1, 1], [], []>} : vector<32x32xf32>, vector<32x32xf32>, vector<32x32xf32> -> vector<32x32xf32>
    %c0_3 = arith.constant 0 : index
    %c0_4 = arith.constant 0 : index
    %3 = vector.load %arg3[%c0_3, %c0_4] : memref<32x32xf32, #tpu.memory_space<vmem>>, vector<32x32xf32>
    tpu.vector_store %arg3[%c0_3, %c0_4], %2 {strides = array<i32>} : memref<32x32xf32, #tpu.memory_space<vmem>>, vector<32x32xf32>,
    return
  }
  func.func @transform_0(%arg0: i32) -> (i32, i32) {
    %c0_i32 = arith.constant 0 : i32
    %c0_i32_0 = arith.constant 0 : i32
    return %arg0, %c0_i32 : i32, i32
  }
  func.func @transform_1(%arg0: i32) -> (i32, i32) {
    %c0_i32 = arith.constant 0 : i32
    %c0_i32_0 = arith.constant 0 : i32
    %c0_i32_1 = arith.constant 0 : i32
    return %c0_i32, %c0_i32_0 : i32, i32
  }
  func.func @transform_2(%arg0: i32) -> (i32, i32) {
    %c0_i32 = arith.constant 0 : i32
    %c0_i32_0 = arith.constant 0 : i32
    return %arg0, %c0_i32 : i32, i32
  }
}

</mosaic_0001>

<bundles_post_ra>
// kernel: tpu_custom_call.1
= control target key start
LH: loop header
LB: loop body
LE: loop exit
PB: predicated region body
PF: predicated region fallthrough
CT: control target
= control target key end

     0   :  { %7 = vsyncpa [#allocation3], 0  ;;  %s263_s0 = inlined_call_operand.hbm [shape: f32[32,32], index: 0, kind: input, shape index: {}]   ;;  %s264_s1 = inlined_call_operand.hbm [shape: f32[32,32], index: 1, kind: input, shape index: {}]   ;;  %s265_s2 = inlined_call_operand.hbm [shape: f32[32,32], index: 2, kind: output, shape index: {}]  }
   0x1   :  { %8 = vsyncpa [#allocation6], 0 }
   0x2   :  { %9 = vsyncpa [#allocation4], 0  ;;  %s14_s11 = sshll.u32 %s263_s0, 4  ;;  %s217_s12 = smov [#allocation2]   ;;  %s15_s11 = int_to_ptr.hbm [resolvable:$true] %s14_s11 }
   0x3   :  { %s16_s13 = sshll.u32 %s217_s12, 4  ;;  %s27_s16 = sshll.u32 %s264_s1, 4  ;;  %s17_s13 = int_to_ptr.vmem [resolvable:$true] %s16_s13  ;;  %s28_s16 = int_to_ptr.hbm [resolvable:$true] %s27_s16 }
   0x4   :  { %s218_s17 = smov 128   ;;  %s219_s18 = smov 8  }
   0x5   :  { %22 = dma.hbm_to_vmem [thread:$0]  %s15_s11, 512, %s17_s13, [#allocation3], %s218_s17, %s218_s17, %s219_s18  }
   0x6   :  { %s220_s19 = smov [#allocation5]  }
   0x7   :  { %s29_s20 = sshll.u32 %s220_s19, 4  ;;  %s30_s20 = int_to_ptr.vmem [resolvable:$true] %s29_s20 }
   0x8   :  { %35 = dma.hbm_to_vmem [thread:$0]  %s28_s16, 512, %s30_s20, [#allocation6], %s218_s17, %s218_s17, %s219_s18  }
   0x9   :  { %211 = dma.done.wait [#allocation3], 512  }
   0xa   :  { %212 = vsyncadd [#allocation3], 4294966784 }
   0xb   :  { %213 = dma.done.wait [#allocation6], 512  }
   0xc   :  { %214 = vsyncadd [#allocation6], 4294966784  ;;  %v51_v0 = vld [vmem:[#allocation5 + $0x18] sm:$0xff]  ;;  %v50_v1 = vld [vmem:[#allocation5 + $0x10] sm:$0xff]  ;;  %vm52_vm0 = vcmask 261120   ;;  %s221_s0 = smov [#allocation7]  }
   0xd   :  { %123 = vmatpush.msra.mxu2 %v51_v0  ;;  %124 = vmatpush.msra.mxu3 %v51_v0  ;;  %v49_v2 = vld [vmem:[#allocation5 + $0x8] sm:$0xff]  ;;  %v48_v3 = vld [vmem:[#allocation5] sm:$0xff]  ;;  %v46_v4 = vld [vmem:[#allocation2 + $0x10] sm:$0xff]  ;;  %s102_s1 = sshll.u32 %s221_s0, 4  ;;  %s104_s23 = sshll.u32 %s265_s2, 4  ;;  %s103_s1 = int_to_ptr.vmem [resolvable:$true] %s102_s1  ;;  %s105_s23 = int_to_ptr.hbm [resolvable:$true] %s104_s23 }
   0xe   :  { %77 = vmatpush.msra.mxu0 %v51_v0  ;;  %122 = vmatpush.msra.mxu1 %v51_v0  ;;  %v47_v5 = vld [vmem:[#allocation2 + $0x18] sm:$0xff]  ;;  %v44_v6 = vld [vmem:[#allocation2] sm:$0xff]  ;;  %v45_v7 = vld [vmem:[#allocation2 + $0x8] sm:$0xff] }
   0xf   :  { %126 = vmatpush.msra.mxu2 %v50_v1  ;;  %127 = vmatpush.msra.mxu3 %v50_v1 }
  0x10   :  { %78 = vmatpush.msra.mxu0 %v50_v1  ;;  %125 = vmatpush.msra.mxu1 %v50_v1 }
  0x11   :  { %129 = vmatpush.msra.mxu2 %v49_v2  ;;  %130 = vmatpush.msra.mxu3 %v49_v2 }
  0x12   :  { %79 = vmatpush.msra.mxu0 %v49_v2  ;;  %128 = vmatpush.msra.mxu1 %v49_v2 }
  0x13   :  { %132 = vmatpush.msra.mxu2 %v48_v3  ;;  %133 = vmatpush.msra.mxu3 %v48_v3 }
  0x14   :  { %120 = vmatmul.msk.f32.vlgmr.msra.gmra.mxu2 %vm52_vm0, %v46_v4  ;;  %121 = vmatmul.msk.f32.vlgmr.msra.gmra.mxu3 %vm52_vm0, %v47_v5 }
  0x15   :  { %80 = vmatpush.msra.mxu0 %v48_v3  ;;  %131 = vmatpush.msra.mxu1 %v48_v3 }
  0x16   :  { %118 = vmatmul.msk.f32.vlgmr.msra.gmra.mxu0 %vm52_vm0, %v44_v6  ;;  %119 = vmatmul.msk.f32.vlgmr.msra.gmra.mxu1 %vm52_vm0, %v45_v7 }
  0x93   :  { %v82_v8 = vpop.f32.mrf.mxu0  ;;  %v85_v9 = vpop.f32.mrf.mxu1 }
  0x94   :  { %94 = vst.msk [vmem:[#allocation7] sm:$0xff] %vm52_vm0, %v82_v8 }
  0x95   :  { %95 = vst.msk [vmem:[#allocation7 + $0x8] sm:$0xff] %vm52_vm0, %v85_v9 }
  0x97   :  { %v88_v10 = vpop.f32.mrf.mxu2  ;;  %v91_v11 = vpop.f32.mrf.mxu3 }
  0x98   :  { %96 = vst.msk [vmem:[#allocation7 + $0x10] sm:$0xff] %vm52_vm0, %v88_v10 }
  0x99   :  { %97 = vst.msk [vmem:[#allocation7 + $0x18] sm:$0xff] %vm52_vm0, %v91_v11 }
  0x9a   :  { %110 = dma.vmem_to_hbm [thread:$0]  %s103_s1, 512, %s105_s23, [#allocation4], %s218_s17, %s218_s17, %s219_s18  }
  0x9b   :  { %215 = dma.done.wait [#allocation4], 512  }
  0x9c   :  { %216 = vsyncadd [#allocation4], 4294966784 }
  0x9d   :  { %115 = vsyncpa [#allocation3], 1 }
  0x9e   :  { %116 = vsyncpa [#allocation6], 1 }
  0x9f   :  { %117 = vsyncpa [#allocation4], 1 }

</bundles_post_ra>
